<compile_context>
chip_gen: v6e
topology: v6e:2x2x1
jax: 0.10.0
libtpu: 0.0.40
codegen_flags: <defaults>
</compile_context>

<pallas_src>
import jax
import jax.numpy as jnp
from jax import lax
from jax.experimental import pallas as pl
from jax.experimental.pallas import tpu as pltpu

_FULL_UNROLL_MAX_T = 16   # fully unroll the recurrence only for tiny T
_FORI_UNROLL = 4          # partial unroll factor for the fori_loop path


def _round_up(x, m):
    return ((x + m - 1) // m) * m


def _lstm_fc_kernel(x_ref, w_ih_ref, w_hh_ref, b_ref, w_fc_ref, b_fc_ref,
                    out_ref, gx_ref):
    """One CLS slab: LSTM recurrence over T steps + final Linear.

    x_ref:    (T, H_in)   bf16  CLS embeddings (unbatched LSTM "sequence")
    w_ih_ref: (H_in, 4Hp) bf16  transposed, gate-lane-padded weight_ih_l0
    w_hh_ref: (Hp, 4Hp)   f32   transposed, padded weight_hh_l0 (f32 keeps the
                                serial h-chain un-quantized)
    b_ref:    (1, 4Hp)    f32   bias_ih_l0 + bias_hh_l0 (padded lanes = 0)
    w_fc_ref: (Hp, Cp)    f32   transposed, padded fc weight
    b_fc_ref: (1, Cp)     f32   padded fc bias
    out_ref:  (1, Cp)     f32   lane-dense logits (first C lanes real)
    gx_ref:   (T, 4Hp)    f32   VMEM scratch: hoisted input projection

    Gate lane order is [i, f, o, g]: one sigmoid over 3Hp lanes, one tanh.
    Zero padding is numerically safe: padded-lane gates are 0 => g = tanh(0) =
    0 and c starts at 0, so padded h/c lanes stay exactly 0.
    """
    T = x_ref.shape[0]
    Hp = w_hh_ref.shape[0]

    # Hoisted input projection: one batched MXU matmul off the serial chain,
    # staged to VMEM scratch so only one (1, 4Hp) row is live per step.
    gx_ref[...] = (
        jnp.dot(x_ref[...], w_ih_ref[...], preferred_element_type=jnp.float32)
        + b_ref[...]
    )

    def step(t, carry):
        h, c = carry
        gates = gx_ref[pl.ds(t, 1), :] + jnp.dot(
            h, w_hh_ref[...], preferred_element_type=jnp.float32)   # (1, 4Hp)
        sig = jax.nn.sigmoid(gates[:, :3 * Hp])      # [i | f | o] in one slab
        i_g = sig[:, 0 * Hp:1 * Hp]
        f_g = sig[:, 1 * Hp:2 * Hp]
        o_g = sig[:, 2 * Hp:3 * Hp]
        g_g = jnp.tanh(gates[:, 3 * Hp:4 * Hp])
        c = f_g * c + i_g * g_g
        h = o_g * jnp.tanh(c)
        return h, c

    h = jnp.zeros((1, Hp), jnp.float32)
    c = jnp.zeros((1, Hp), jnp.float32)
    if T <= _FULL_UNROLL_MAX_T:
        for t in range(T):                      # tiny T: full static unroll
            h, c = step(t, (h, c))
    else:
        # Large T: bounded live ranges + modest unroll for LLO visibility.
        h, c = lax.fori_loop(0, T, step, (h, c), unroll=_FORI_UNROLL)

    # nn.Dropout(0.5) is identity in eval mode; h == h_n[-1].
    out_ref[...] = (
        jnp.dot(h, w_fc_ref[...], preferred_element_type=jnp.float32)
        + b_fc_ref[...]
    )


def prepare_bert_lstm_params(params):
    """One-time weight transform (pad / transpose / cast). Call once, reuse."""
    H = params["w_hh"].shape[1]
    C = params["b_fc"].shape[0]
    Hp = _round_up(H, 128)                      # lane-pad hidden size
    Cp = _round_up(C, 128)                      # lane-pad logits
    # torch gate order [i, f, g, o]  ->  kernel lane order [i, f, o, g]
    perm = jnp.array([0, 1, 3, 2])

    def pad_gate_cols(w):                       # w: (4H, K) torch layout
        w4 = w.reshape(4, H, -1)[perm]          # (4, H, K) reordered gates
        w4 = jnp.pad(w4, ((0, 0), (0, Hp - H), (0, 0)))
        return jnp.transpose(w4.reshape(4 * Hp, -1))        # (K, 4Hp)

    w_ih_t = pad_gate_cols(params["w_ih"]).astype(jnp.bfloat16)        # (H_in, 4Hp)
    w_hh_t = jnp.pad(pad_gate_cols(params["w_hh"]),
                     ((0, Hp - H), (0, 0))).astype(jnp.float32)        # (Hp, 4Hp)
    b4 = (params["b_ih"] + params["b_hh"]).reshape(4, H)[perm]
    b = jnp.pad(b4, ((0, 0), (0, Hp - H))).reshape(1, 4 * Hp).astype(jnp.float32)
    w_fc_t = jnp.pad(params["w_fc"].T,
                     ((0, Hp - H), (0, Cp - C))).astype(jnp.float32)   # (Hp, Cp)
    b_fc = jnp.pad(params["b_fc"], (0, Cp - C)).reshape(1, Cp).astype(jnp.float32)

    return dict(w_ih_t=w_ih_t, w_hh_t=w_hh_t, b=b, w_fc_t=w_fc_t, b_fc=b_fc,
                H=H, C=C, Hp=Hp, Cp=Cp)


def bert_lstm_forward_slabs(hidden_states_slabs, prepared):
    """N independent forwards in one pallas_call.

    hidden_states_slabs: (N, B, S, H_bert) -> logits (N, num_classes).
    The slab axis is a "parallel" grid axis; weights use constant index_maps
    so they stay VMEM-resident across slabs.
    """
    cls = hidden_states_slabs[:, :, 0, :]       # (N, T, H_in), T = B
    N, T, H_in = cls.shape
    Hp, Cp, C = prepared["Hp"], prepared["Cp"], prepared["C"]

    x = cls.astype(jnp.bfloat16)
    w_ih_t, w_hh_t = prepared["w_ih_t"], prepared["w_hh_t"]
    b, w_fc_t, b_fc = prepared["b"], prepared["w_fc_t"], prepared["b_fc"]

    # Advisory cost estimate + explicit scoped-VMEM limit (v7x has the
    # smallest default scoped limit).
    flops = N * (2 * T * H_in * 4 * Hp + 2 * T * Hp * 4 * Hp + 2 * Hp * Cp)
    transcendentals = N * T * 6 * Hp
    operand_bytes = (x.size * 2 + w_ih_t.size * 2 + w_hh_t.size * 4
                     + b.size * 4 + w_fc_t.size * 4 + b_fc.size * 4)
    out_bytes = N * Cp * 4
    scratch_bytes = T * 4 * Hp * 4
    vmem_limit = int(min(max(2 * (operand_bytes + out_bytes) + scratch_bytes,
                             32 * 1024 * 1024), 100 * 1024 * 1024))

    out = pl.pallas_call(
        _lstm_fc_kernel,
        out_shape=jax.ShapeDtypeStruct((N, 1, Cp), jnp.float32),
        grid_spec=pltpu.PrefetchScalarGridSpec(
            num_scalar_prefetch=0,
            grid=(N,),
            in_specs=[
                pl.BlockSpec((None, T, H_in), lambda s: (s, 0, 0)),  # per-slab x
                pl.BlockSpec((H_in, 4 * Hp), lambda s: (0, 0)),      # weights:
                pl.BlockSpec((Hp, 4 * Hp), lambda s: (0, 0)),        #  constant maps
                pl.BlockSpec((1, 4 * Hp), lambda s: (0, 0)),         #  -> stay
                pl.BlockSpec((Hp, Cp), lambda s: (0, 0)),            #  VMEM-resident
                pl.BlockSpec((1, Cp), lambda s: (0, 0)),
            ],
            out_specs=pl.BlockSpec((None, 1, Cp), lambda s: (s, 0, 0)),
            scratch_shapes=[pltpu.VMEM((T, 4 * Hp), jnp.float32)],
        ),
        compiler_params=pltpu.CompilerParams(
            dimension_semantics=("parallel",),
            vmem_limit_bytes=vmem_limit),
        cost_estimate=pl.CostEstimate(
            flops=flops, transcendentals=transcendentals,
            bytes_accessed=operand_bytes + out_bytes),
    )(x, w_ih_t, w_hh_t, b, w_fc_t, b_fc)

    return out[:, 0, :C]


def bert_lstm_forward(hidden_states, prepared):
    """Single forward matching the module: (B, S, H_bert) -> (num_classes,)."""
    return bert_lstm_forward_slabs(hidden_states[None], prepared)[0]


def _ref_forward(hidden_states, params):
    """Pure-JAX f32 reference of the same semantics."""
    cls = hidden_states[:, 0, :]
    H = params["w_hh"].shape[1]

    def step(carry, x_t):
        h, c = carry
        gates = (x_t @ params["w_ih"].T + h @ params["w_hh"].T
                 + params["b_ih"] + params["b_hh"])
        i = jax.nn.sigmoid(gates[0 * H:1 * H])
        f = jax.nn.sigmoid(gates[1 * H:2 * H])
        g = jnp.tanh(gates[2 * H:3 * H])
        o = jax.nn.sigmoid(gates[3 * H:4 * H])
        c = f * c + i * g
        h = o * jnp.tanh(c)
        return (h, c), None

    (h, _), _ = lax.scan(step, (jnp.zeros(H), jnp.zeros(H)), cls)
    return h @ params["w_fc"].T + params["b_fc"]


if __name__ == "__main__":
    # Small shapes consistent with the module: batch=2, seq=8, bert_hidden=32,
    # lstm_hidden=16, num_classes=4, bidirectional=False.
    B, S, H_BERT = 2, 8, 32
    H_LSTM, NUM_CLASSES = 16, 4

    key = jax.random.PRNGKey(0)
    k = jax.random.split(key, 8)
    hidden_states = jax.random.normal(k[0], (B, S, H_BERT), dtype=jnp.float32)

    bound = float(1.0 / (H_LSTM ** 0.5))   # PyTorch default U(-1/sqrt(H), 1/sqrt(H))
    params = {
        "w_ih": jax.random.uniform(k[1], (4 * H_LSTM, H_BERT), jnp.float32, -bound, bound),
        "w_hh": jax.random.uniform(k[2], (4 * H_LSTM, H_LSTM), jnp.float32, -bound, bound),
        "b_ih": jax.random.uniform(k[3], (4 * H_LSTM,), jnp.float32, -bound, bound),
        "b_hh": jax.random.uniform(k[4], (4 * H_LSTM,), jnp.float32, -bound, bound),
        "w_fc": jax.random.uniform(k[5], (NUM_CLASSES, H_LSTM), jnp.float32, -bound, bound),
        "b_fc": jax.random.uniform(k[6], (NUM_CLASSES,), jnp.float32, -bound, bound),
    }

    # One-time weight transform, reused across forwards (not in the hot path).
    prepared = prepare_bert_lstm_params(params)

    # Single forward (module semantics).
    out = jax.block_until_ready(bert_lstm_forward(hidden_states, prepared))
    ref = jax.block_until_ready(_ref_forward(hidden_states, params))
    assert out.shape == (NUM_CLASSES,), out.shape
    # bf16 x-projection with f32 accumulation -> bf16-appropriate tolerance.
    assert jnp.allclose(out, ref, atol=3e-2, rtol=3e-2), (out, ref)

    # Multi-slab path: 3 independent forwards in a single pallas_call
    # (parallel grid axis, weights resident in VMEM across slabs).
    hs_slabs = jax.random.normal(k[7], (3, B, S, H_BERT), dtype=jnp.float32)
    out_slabs = jax.block_until_ready(bert_lstm_forward_slabs(hs_slabs, prepared))
    ref_slabs = jnp.stack([_ref_forward(hs_slabs[i], params) for i in range(3)])
    assert out_slabs.shape == (3, NUM_CLASSES), out_slabs.shape
    assert jnp.allclose(out_slabs, ref_slabs, atol=3e-2, rtol=3e-2), (out_slabs, ref_slabs)

    print("KERNEL_OK")
</pallas_src>

<mosaic_0001>
module attributes {stable_mosaic.version = 11 : i64} {
  func.func @_lstm_fc_kernel(%arg0: i32, %arg1: memref<1x2x32xbf16, #tpu.memory_space<vmem>>, %arg2: memref<32x512xbf16, #tpu.memory_space<vmem>>, %arg3: memref<128x512xf32, #tpu.memory_space<vmem>>, %arg4: memref<1x512xf32, #tpu.memory_space<vmem>>, %arg5: memref<128x128xf32, #tpu.memory_space<vmem>>, %arg6: memref<1x128xf32, #tpu.memory_space<vmem>>, %arg7: memref<1x1x128xf32, #tpu.memory_space<vmem>>, %arg8: memref<2x512xf32, #tpu.memory_space<vmem>>) attributes {dimension_semantics = [#tpu.dimension_semantics<parallel>], iteration_bounds = array<i64: 1>, scalar_prefetch = 0 : i64, scratch_operands = 1 : i64, tpu.core_type = #tpu.core_type<tc>, window_params = [{transform_indices = @transform_0, window_bounds = array<i64: 1, 2, 32>}, {pipeline_mode = #tpu.pipeline_mode<synchronous>, transform_indices = @transform_1, window_bounds = array<i64: 32, 512>}, {pipeline_mode = #tpu.pipeline_mode<synchronous>, transform_indices = @transform_2, window_bounds = array<i64: 128, 512>}, {pipeline_mode = #tpu.pipeline_mode<synchronous>, transform_indices = @transform_3, window_bounds = array<i64: 1, 512>}, {pipeline_mode = #tpu.pipeline_mode<synchronous>, transform_indices = @transform_4, window_bounds = array<i64: 128, 128>}, {pipeline_mode = #tpu.pipeline_mode<synchronous>, transform_indices = @transform_5, window_bounds = array<i64: 1, 128>}, {transform_indices = @transform_6, window_bounds = array<i64: 1, 1, 128>}]} {
    %c0 = arith.constant 0 : index
    %c0_0 = arith.constant 0 : index
    %c0_1 = arith.constant 0 : index
    %0 = vector.load %arg1[%c0, %c0_0, %c0_1] : memref<1x2x32xbf16, #tpu.memory_space<vmem>>, vector<1x2x32xbf16>
    %1 = vector.shape_cast %0 : vector<1x2x32xbf16> to vector<2x32xbf16>
    %c0_2 = arith.constant 0 : index
    %c0_3 = arith.constant 0 : index
    %2 = vector.load %arg2[%c0_2, %c0_3] : memref<32x512xbf16, #tpu.memory_space<vmem>>, vector<32x512xbf16>
    %cst = arith.constant dense<0.000000e+00> : vector<2x512xf32>
    %3 = tpu.matmul %1, %2, %cst {dimension_numbers = #tpu.dot_dimension_numbers<[1], [0], [0], [1], [0, 0, 1, 1], [], []>} : vector<2x32xbf16>, vector<32x512xbf16>, vector<2x512xf32> -> vector<2x512xf32>
    %c0_4 = arith.constant 0 : index
    %c0_5 = arith.constant 0 : index
    %4 = vector.load %arg4[%c0_4, %c0_5] : memref<1x512xf32, #tpu.memory_space<vmem>>, vector<1x512xf32>
    %5 = vector.broadcast %4 : vector<1x512xf32> to vector<2x512xf32>
    %6 = arith.addf %3, %5 : vector<2x512xf32>
    %c0_6 = arith.constant 0 : index
    %c0_7 = arith.constant 0 : index
    %7 = vector.load %arg8[%c0_6, %c0_7] : memref<2x512xf32, #tpu.memory_space<vmem>>, vector<2x512xf32>
    tpu.vector_store %arg8[%c0_6, %c0_7], %6 {strides = array<i32>} : memref<2x512xf32, #tpu.memory_space<vmem>>, vector<2x512xf32>,
    %cst_8 = arith.constant 0.000000e+00 : f32
    %8 = vector.broadcast %cst_8 : f32 to vector<1x128xf32>
    %cst_9 = arith.constant 0.000000e+00 : f32
    %9 = vector.broadcast %cst_9 : f32 to vector<1x128xf32>
    %c0_10 = arith.constant 0 : index
    %c0_11 = arith.constant 0 : index
    %10 = vector.load %arg8[%c0_10, %c0_11] : memref<2x512xf32, #tpu.memory_space<vmem>>, vector<1x512xf32>
    %c0_12 = arith.constant 0 : index
    %c0_13 = arith.constant 0 : index
    %11 = vector.load %arg3[%c0_12, %c0_13] : memref<128x512xf32, #tpu.memory_space<vmem>>, vector<128x512xf32>
    %cst_14 = arith.constant dense<0.000000e+00> : vector<1x512xf32>
    %12 = tpu.matmul %8, %11, %cst_14 {dimension_numbers = #tpu.dot_dimension_numbers<[1], [0], [0], [1], [0, 0, 1, 1], [], []>} : vector<1x128xf32>, vector<128x512xf32>, vector<1x512xf32> -> vector<1x512xf32>
    %13 = arith.addf %10, %12 : vector<1x512xf32>
    %14 = vector.extract_strided_slice %13 {offsets = [0, 0], sizes = [1, 384], strides = [1, 1]} : vector<1x512xf32> to vector<1x384xf32>
    %15 = arith.negf %14 : vector<1x384xf32>
    %16 = math.exp %15 : vector<1x384xf32>
    %cst_15 = arith.constant 1.000000e+00 : f32
    %17 = vector.broadcast %cst_15 : f32 to vector<1x384xf32>
    %18 = arith.addf %17, %16 : vector<1x384xf32>
    %19 = arith.divf %17, %18 : vector<1x384xf32>
    %20 = vector.extract_strided_slice %19 {offsets = [0, 0], sizes = [1, 128], strides = [1, 1]} : vector<1x384xf32> to vector<1x128xf32>
    %21 = vector.extract_strided_slice %19 {offsets = [0, 128], sizes = [1, 128], strides = [1, 1]} : vector<1x384xf32> to vector<1x128xf32>
    %22 = vector.extract_strided_slice %19 {offsets = [0, 256], sizes = [1, 128], strides = [1, 1]} : vector<1x384xf32> to vector<1x128xf32>
    %23 = vector.extract_strided_slice %13 {offsets = [0, 384], sizes = [1, 128], strides = [1, 1]} : vector<1x512xf32> to vector<1x128xf32>
    %24 = math.tanh %23 : vector<1x128xf32>
    %25 = arith.mulf %21, %9 : vector<1x128xf32>
    %26 = arith.mulf %20, %24 : vector<1x128xf32>
    %27 = arith.addf %25, %26 : vector<1x128xf32>
    %28 = math.tanh %27 : vector<1x128xf32>
    %29 = arith.mulf %22, %28 : vector<1x128xf32>
    %c1 = arith.constant 1 : index
    %c0_16 = arith.constant 0 : index
    %30 = vector.load %arg8[%c1, %c0_16] : memref<2x512xf32, #tpu.memory_space<vmem>>, vector<1x512xf32>
    %c0_17 = arith.constant 0 : index
    %c0_18 = arith.constant 0 : index
    %31 = vector.load %arg3[%c0_17, %c0_18] : memref<128x512xf32, #tpu.memory_space<vmem>>, vector<128x512xf32>
    %cst_19 = arith.constant dense<0.000000e+00> : vector<1x512xf32>
    %32 = tpu.matmul %29, %31, %cst_19 {dimension_numbers = #tpu.dot_dimension_numbers<[1], [0], [0], [1], [0, 0, 1, 1], [], []>} : vector<1x128xf32>, vector<128x512xf32>, vector<1x512xf32> -> vector<1x512xf32>
    %33 = arith.addf %30, %32 : vector<1x512xf32>
    %34 = vector.extract_strided_slice %33 {offsets = [0, 0], sizes = [1, 384], strides = [1, 1]} : vector<1x512xf32> to vector<1x384xf32>
    %35 = arith.negf %34 : vector<1x384xf32>
    %36 = math.exp %35 : vector<1x384xf32>
    %cst_20 = arith.constant 1.000000e+00 : f32
    %37 = vector.broadcast %cst_20 : f32 to vector<1x384xf32>
    %38 = arith.addf %37, %36 : vector<1x384xf32>
    %39 = arith.divf %37, %38 : vector<1x384xf32>
    %40 = vector.extract_strided_slice %39 {offsets = [0, 0], sizes = [1, 128], strides = [1, 1]} : vector<1x384xf32> to vector<1x128xf32>
    %41 = vector.extract_strided_slice %39 {offsets = [0, 128], sizes = [1, 128], strides = [1, 1]} : vector<1x384xf32> to vector<1x128xf32>
    %42 = vector.extract_strided_slice %39 {offsets = [0, 256], sizes = [1, 128], strides = [1, 1]} : vector<1x384xf32> to vector<1x128xf32>
    %43 = vector.extract_strided_slice %33 {offsets = [0, 384], sizes = [1, 128], strides = [1, 1]} : vector<1x512xf32> to vector<1x128xf32>
    %44 = math.tanh %43 : vector<1x128xf32>
    %45 = arith.mulf %41, %27 : vector<1x128xf32>
    %46 = arith.mulf %40, %44 : vector<1x128xf32>
    %47 = arith.addf %45, %46 : vector<1x128xf32>
    %48 = math.tanh %47 : vector<1x128xf32>
    %49 = arith.mulf %42, %48 : vector<1x128xf32>
    %c0_21 = arith.constant 0 : index
    %c0_22 = arith.constant 0 : index
    %50 = vector.load %arg5[%c0_21, %c0_22] : memref<128x128xf32, #tpu.memory_space<vmem>>, vector<128x128xf32>
    %cst_23 = arith.constant dense<0.000000e+00> : vector<1x128xf32>
    %51 = tpu.matmul %49, %50, %cst_23 {dimension_numbers = #tpu.dot_dimension_numbers<[1], [0], [0], [1], [0, 0, 1, 1], [], []>} : vector<1x128xf32>, vector<128x128xf32>, vector<1x128xf32> -> vector<1x128xf32>
    %c0_24 = arith.constant 0 : index
    %c0_25 = arith.constant 0 : index
    %52 = vector.load %arg6[%c0_24, %c0_25] : memref<1x128xf32, #tpu.memory_space<vmem>>, vector<1x128xf32>
    %53 = arith.addf %51, %52 : vector<1x128xf32>
    %c0_26 = arith.constant 0 : index
    %c0_27 = arith.constant 0 : index
    %c0_28 = arith.constant 0 : index
    %54 = vector.load %arg7[%c0_26, %c0_27, %c0_28] : memref<1x1x128xf32, #tpu.memory_space<vmem>>, vector<1x1x128xf32>
    %55 = vector.shape_cast %54 : vector<1x1x128xf32> to vector<1x128xf32>
    %56 = vector.shape_cast %53 : vector<1x128xf32> to vector<1x1x128xf32>
    tpu.vector_store %arg7[%c0_26, %c0_27, %c0_28], %56 {strides = array<i32>} : memref<1x1x128xf32, #tpu.memory_space<vmem>>, vector<1x1x128xf32>,
    return
  }
  func.func @transform_0(%arg0: i32) -> (i32, i32, i32) {
    %c0_i32 = arith.constant 0 : i32
    %c0_i32_0 = arith.constant 0 : i32
    %c0_i32_1 = arith.constant 0 : i32
    return %arg0, %c0_i32, %c0_i32_0 : i32, i32, i32
  }
  func.func @transform_1(%arg0: i32) -> (i32, i32) {
    %c0_i32 = arith.constant 0 : i32
    %c0_i32_0 = arith.constant 0 : i32
    %c0_i32_1 = arith.constant 0 : i32
    return %c0_i32, %c0_i32_0 : i32, i32
  }
  func.func @transform_2(%arg0: i32) -> (i32, i32) {
    %c0_i32 = arith.constant 0 : i32
    %c0_i32_0 = arith.constant 0 : i32
    %c0_i32_1 = arith.constant 0 : i32
    return %c0_i32, %c0_i32_0 : i32, i32
  }
  func.func @transform_3(%arg0: i32) -> (i32, i32) {
    %c0_i32 = arith.constant 0 : i32
    %c0_i32_0 = arith.constant 0 : i32
    %c0_i32_1 = arith.constant 0 : i32
    return %c0_i32, %c0_i32_0 : i32, i32
  }
  func.func @transform_4(%arg0: i32) -> (i32, i32) {
    %c0_i32 = arith.constant 0 : i32
    %c0_i32_0 = arith.constant 0 : i32
    %c0_i32_1 = arith.constant 0 : i32
    return %c0_i32, %c0_i32_0 : i32, i32
  }
  func.func @transform_5(%arg0: i32) -> (i32, i32) {
    %c0_i32 = arith.constant 0 : i32
    %c0_i32_0 = arith.constant 0 : i32
    %c0_i32_1 = arith.constant 0 : i32
    return %c0_i32, %c0_i32_0 : i32, i32
  }
  func.func @transform_6(%arg0: i32) -> (i32, i32, i32) {
    %c0_i32 = arith.constant 0 : i32
    %c0_i32_0 = arith.constant 0 : i32
    %c0_i32_1 = arith.constant 0 : i32
    return %arg0, %c0_i32, %c0_i32_0 : i32, i32, i32
  }
}

</mosaic_0001>

<bundles_post_ra>
// kernel: tpu_custom_call.1
= control target key start
LH: loop header
LB: loop body
LE: loop exit
PB: predicated region body
PF: predicated region fallthrough
CT: control target
= control target key end

     0   :  { %11 = vsyncpa [#allocation4], 0  ;;  %s1395_s0 = inlined_call_operand.hbm [shape: bf16[1,2,32], index: 0, kind: input, shape index: {}]   ;;  %s1396_s1 = inlined_call_operand.hbm [shape: bf16[32,512], index: 1, kind: input, shape index: {}]   ;;  %s1397_s2 = inlined_call_operand.hbm [shape: f32[128,512], index: 2, kind: input, shape index: {}]   ;;  %s1398_s3 = inlined_call_operand.vmem [shape: f32[1,512], index: 3, kind: input, shape index: {}]   ;;  %s1399_s4 = inlined_call_operand.hbm [shape: f32[128,128], index: 4, kind: input, shape index: {}]   ;;  %s1400_s5 = inlined_call_operand.vmem [shape: f32[1,128], index: 5, kind: input, shape index: {}]   ;;  %s1401_s6 = inlined_call_operand.hbm [shape: f32[1,1,128], index: 6, kind: output, shape index: {}]  }
   0x1   :  { %12 = vsyncpa [#allocation7], 0 }
   0x2   :  { %13 = vsyncpa [#allocation10], 0 }
   0x3   :  { %14 = vsyncpa [#allocation5], 0  ;;  %s1030_s21 = smov [#allocation6]  }
   0x4   :  { %s30_s22 = sshll.u32 %s1030_s21, 4  ;;  %s31_s22 = int_to_ptr.vmem [resolvable:$true] %s30_s22 }
   0x5   :  { %s930_s23 = scalar_lea.vmem %s31_s22, 1024  ;;  %p935_p1 = scmp.lt.s32.totalorder %s31_s22, %s31_s22 }
   0x6   :  { %p931_p0 = scmp.ne.s32.totalorder %s31_s22, %s930_s23  ;;  %p936_p2 = scmp.lt.s32.totalorder %s930_s23, %s930_s23 }
   0x8   :  { %p937_p3 = por %p936_p2, %p935_p1 }
   0xa   :  { %p938_p4 = pnand %p937_p3, %p931_p0 }
   0xc   :  { %941 = shalt.err (!%p938_p4)
}
   0xd   :  { %s1031_s24 = smov 256   ;;  %s1032_s25 = smov 16  }
   0xe   :  { %36 = dma.hbm_to_vmem [thread:$0]  %s1396_s1, 1024, %s31_s22, [#allocation7], %s1031_s24, %s1031_s24, %s1032_s25  }
   0xf   :  { %s1033_s28 = smov [#allocation3]   ;;  %s1034_s30 = smov [#allocation8]  }
  0x10   :  { %s21_s29 = sshll.u32 %s1033_s28, 4  ;;  %s42_s7 = sshll.u32 %s1034_s30, 4  ;;  %s22_s29 = int_to_ptr.vmem [resolvable:$true] %s21_s29  ;;  %s43_s7 = int_to_ptr.vmem [resolvable:$true] %s42_s7 }
  0x11   :  { %s950_s8 = scalar_lea.vmem %s22_s29, 16  ;;  %s954_s9 = scalar_lea.vmem %s22_s29, 32 }
  0x12   :  { %p951_p5 = scmp.ne.s32.totalorder %s22_s29, %s950_s8  ;;  %p955_p6 = scmp.lt.s32.totalorder %s22_s29, %s22_s29 }
  0x13   :  { %p956_p7 = scmp.lt.s32.totalorder %s954_s9, %s950_s8 }
  0x15   :  { %p957_p8 = por %p956_p7, %p955_p6 }
  0x17   :  { %p958_p9 = pnand %p957_p8, %p951_p5 }
  0x19   :  { %961 = shalt.err (!%p958_p9)
}
  0x1a   :  { %24 = dma.hbm_to_vmem [thread:$0]  %s1395_s0, 16, %s22_s29, [#allocation4]  }
  0x1b   :  { %s970_s12 = scalar_lea.vmem %s43_s7, 8192  ;;  %p975_p11 = scmp.lt.s32.totalorder %s43_s7, %s43_s7 }
  0x1c   :  { %p971_p10 = scmp.ne.s32.totalorder %s43_s7, %s970_s12  ;;  %p976_p12 = scmp.lt.s32.totalorder %s970_s12, %s970_s12 }
  0x1e   :  { %p977_p13 = por %p976_p12, %p975_p11 }
  0x20   :  { %p978_p0 = pnand %p977_p13, %p971_p10 }
  0x22   :  { %981 = shalt.err (!%p978_p0)
}
  0x23   :  { %s1035_s1 = smov 512   ;;  %s1036_s13 = smov 32  }
  0x24   :  { %48 = dma.hbm_to_vmem [thread:$0]  %s1397_s2, 8192, %s43_s7, [#allocation7], %s1035_s1, %s1035_s1, %s1036_s13  }
  0x25   :  { %s1037_s16 = smov [#allocation9]  }
  0x26   :  { %s56_s17 = sshll.u32 %s1037_s16, 4  ;;  %s57_s17 = int_to_ptr.vmem [resolvable:$true] %s56_s17 }
  0x27   :  { %s990_s18 = scalar_lea.vmem %s57_s17, 2048  ;;  %p995_p2 = scmp.lt.s32.totalorder %s57_s17, %s57_s17 }
  0x28   :  { %p991_p1 = scmp.ne.s32.totalorder %s57_s17, %s990_s18  ;;  %p996_p3 = scmp.lt.s32.totalorder %s990_s18, %s990_s18 }
  0x2a   :  { %p997_p4 = por %p996_p3, %p995_p2 }
  0x2c   :  { %p998_p5 = pnand %p997_p4, %p991_p1 }
  0x2e   :  { %1001 = shalt.err (!%p998_p5)
}
  0x2f   :  { %s1038_s0 = smov 128   ;;  %s1039_s19 = smov 8  }
  0x30   :  { %62 = dma.hbm_to_vmem [thread:$0]  %s1399_s4, 2048, %s57_s17, [#allocation10], %s1038_s0, %s1038_s0, %s1039_s19  }
  0x31   :  { %1022 = dma.done.wait [#allocation4], 16  }
  0x32   :  { %1023 = vsyncadd [#allocation4], 4294967280 }
  0x33   :  { %1024 = dma.done.wait [#allocation7], 9216  }
  0x34   :  { %1025 = vsyncadd [#allocation7], 4294958080 }
  0x35   :  { %1026 = dma.done.wait [#allocation10], 2048  }
  0x36   :  { %1027 = vsyncadd [#allocation10], 4294965248  ;;  %v1040_v0 = vmov 0   ;;  %v1041_v1 = vmov 0.0   ;;  %v894_v2 = vld [vmem:[#allocation6 + $0x24] ss:$16 sps:$4 sm:$0xff]  }
  0x37   :  { %185 = vmatprep.mubr.bf16.mxu1 %v1040_v0  ;;  %387 = vmatprep.mubr.f32.mxu0 %v1041_v1  ;;  %v896_v3 = vld [vmem:[#allocation6 + $0x20] ss:$16 sps:$4 sm:$0xff]   ;;  %v897_v4 = vld [vmem:[#allocation6 + $0x4] ss:$16 sps:$4 sm:$0xff]   ;;  %v902_v6 = vld [vmem:[#allocation6 + $0x2c] ss:$16 sps:$4 sm:$0xff]  }
  0x38   :  { %165 = vmatprep.subr.bf16.mxu1 %v894_v2  ;;  %v899_v5 = vld [vmem:[#allocation6] ss:$16 sps:$4 sm:$0xff]   ;;  %v1094_v7 = vld [vmem:[#allocation8 + $0x1e8] sm:$0xff]  ;;  %v78_v8 = vld [vmem:[#allocation3] sm:$0x1]  ;;  %vm149_vm0 = vcmask 261120  }
  0x39   :  { %166 = vmatpush1.bf16.msra.mxu1 %v896_v3  ;;  %323 = vmatprep.subr.mxu0 %v1094_v7  ;;  %v1097_v9 = vld [vmem:[#allocation8 + $0x1e0] sm:$0xff]  ;;  %v1099_v10 = vld [vmem:[#allocation8 + $0x1c8] sm:$0xff]  ;;  %v1119_v20 = vld [vmem:[#allocation8 + $0x1f8] sm:$0xff]  ;;  %vm1044_vm1 = vmmov 0   ;;  %s1045_s23 = smov [#allocation11]  }
  0x3a   :  { %167 = vmatprep.subr.bf16.mxu1 %v897_v4  ;;  %v900_v11 = vld [vmem:[#allocation6 + $0x28] ss:$16 sps:$4 sm:$0xff]   ;;  %324 = vmatpush1.msra.mxu0 %v1097_v9  ;;  %v1102_v12 = vld [vmem:[#allocation8 + $0x1c0] sm:$0xff]  ;;  %v905_v14 = vld [vmem:[#allocation6 + $0xc] ss:$16 sps:$4 sm:$0xff]   ;;  %s803_s24 = sshll.u32 %s1045_s23, 4  ;;  %s804_s24 = int_to_ptr.vmem [resolvable:$true] %s803_s24 }
  0x3b   :  { %v1104_v13 = vld [vmem:[#allocation8 + $0x1a8] sm:$0xff]  ;;  %325 = vmatprep.subr.mxu0 %v1099_v10  ;;  %v1108_v15 = vld [vmem:[#allocation8 + $0x1a0] sm:$0xff]  ;;  %v1131_v24 = vld [vmem:[#allocation8 + $0x1f0] sm:$0xff]  ;;  %s1002_s25 = scalar_lea.vmem %s804_s24, 16  ;;  %s1006_s26 = scalar_lea.vmem %s804_s24, 32 }
  0x3c   :  { %326 = vmatpush1.msra.mxu0 %v1102_v12  ;;  %v1112_v16 = vld [vmem:[#allocation8 + $0x188] sm:$0xff]  ;;  %v1114_v18 = vld [vmem:[#allocation8 + $0x180] sm:$0xff]  ;;  %v1136_v26 = vld [vmem:[#allocation8 + $0x1d8] sm:$0xff]  ;;  %p1003_p6 = scmp.ne.s32.totalorder %s804_s24, %s1002_s25  ;;  %p1007_p7 = scmp.lt.s32.totalorder %s804_s24, %s804_s24 }
  0x3d   :  { %168 = vmatpush1.bf16.msra.mxu1 %v899_v5  ;;  %327 = vmatprep.subr.mxu0 %v1104_v13  ;;  %v903_v17 = vld [vmem:[#allocation6 + $0x8] ss:$16 sps:$4 sm:$0xff]   ;;  %v1122_v21 = vld [vmem:[#allocation8 + $0x160] sm:$0xff]  ;;  %v1142_v28 = vld [vmem:[#allocation8 + $0x1d0] sm:$0xff]  ;;  %p1008_p8 = scmp.lt.s32.totalorder %s1006_s26, %s1002_s25 }
  0x3e   :  { %206 = vmatprep.subr.bf16.mxu1 %v902_v6  ;;  %328 = vmatpush1.msra.mxu0 %v1108_v15  ;;  %v1117_v19 = vld [vmem:[#allocation8 + $0x168] sm:$0xff]  ;;  %v1128_v23 = vld [vmem:[#allocation8 + $0x140] sm:$0xff]  ;;  %v1148_v30 = vld [vmem:[#allocation8 + $0x1b8] sm:$0xff] }
  0x3f   :  { %329 = vmatprep.subr.mxu0 %v1112_v16  ;;  %v1125_v22 = vld [vmem:[#allocation8 + $0x148] sm:$0xff]  ;;  %v1139_v27 = vld [vmem:[#allocation8 + $0x120] sm:$0xff]  ;;  %v1154_v32 = vld [vmem:[#allocation8 + $0x1b0] sm:$0xff]  ;;  %p1009_p9 = por %p1008_p8, %p1007_p7 }
  0x40   :  { %822 = vmatmul.mubr.msk.bf16.vlgmr.msra.gmra.mxu1 %vm149_vm0, %v78_v8  ;;  %330 = vmatpush1.msra.mxu0 %v1114_v18  ;;  %v1134_v25 = vld [vmem:[#allocation8 + $0x128] sm:$0xff]  ;;  %v1151_v31 = vld [vmem:[#allocation8 + $0x100] sm:$0xff]  ;;  %v1160_v34 = vld [vmem:[#allocation8 + $0x198] sm:$0xff] }
  0x41   :  { %207 = vmatpush1.bf16.msra.mxu1 %v900_v11  ;;  %226 = vmatprep.mubr.bf16.mxu1 %v1040_v0  ;;  %v1145_v29 = vld [vmem:[#allocation8 + $0x108] sm:$0xff]  ;;  %v1163_v35 = vld [vmem:[#allocation8 + $0xe0] sm:$0xff]  ;;  %v1166_v36 = vld [vmem:[#allocation8 + $0x190] sm:$0xff]  ;;  %p1010_p10 = pnand %p1009_p9, %p1003_p6 }
  0x42   :  { %208 = vmatprep.subr.bf16.mxu1 %v905_v14  ;;  %331 = vmatprep.subr.mxu0 %v1117_v19  ;;  %v1157_v33 = vld [vmem:[#allocation8 + $0xe8] sm:$0xff]  ;;  %v1172_v38 = vld [vmem:[#allocation8 + $0x178] sm:$0xff]  ;;  %v1175_v39 = vld [vmem:[#allocation8 + $0xc0] sm:$0xff] }
  0x43   :  { %332 = vmatpush1.msra.mxu0 %v1122_v21  ;;  %v1169_v37 = vld [vmem:[#allocation8 + $0xc8] sm:$0xff]  ;;  %v1178_v40 = vld [vmem:[#allocation8 + $0x170] sm:$0xff]  ;;  %v1184_v42 = vld [vmem:[#allocation8 + $0x158] sm:$0xff] }
  0x44   :  { %333 = vmatprep.subr.mxu0 %v1125_v22  ;;  %v1181_v41 = vld [vmem:[#allocation8 + $0xa8] sm:$0xff]  ;;  %v1187_v43 = vld [vmem:[#allocation8 + $0xa0] sm:$0xff]  ;;  %v1190_v44 = vld [vmem:[#allocation8 + $0x150] sm:$0xff] }
  0x45   :  { %209 = vmatpush1.bf16.msra.mxu1 %v903_v17  ;;  %334 = vmatpush1.msra.mxu0 %v1128_v23  ;;  %v1193_v45 = vld [vmem:[#allocation8 + $0x88] sm:$0xff]  ;;  %v1196_v46 = vld [vmem:[#allocation8 + $0x138] sm:$0xff]  ;;  %v1199_v47 = vld [vmem:[#allocation8 + $0x80] sm:$0xff] }
  0x46   :  { %394 = vmatprep.subr.mxu1 %v1119_v20  ;;  %335 = vmatprep.subr.mxu0 %v1134_v25  ;;  %v1202_v48 = vld [vmem:[#allocation8 + $0x130] sm:$0xff]  ;;  %v1205_v49 = vld [vmem:[#allocation8 + $0x68] sm:$0xff]  ;;  %v1208_v50 = vld [vmem:[#allocation8 + $0x118] sm:$0xff] }
  0x47   :  { %336 = vmatpush1.msra.mxu0 %v1139_v27  ;;  %v1211_v51 = vld [vmem:[#allocation8 + $0x60] sm:$0xff]  ;;  %v1214_v52 = vld [vmem:[#allocation8 + $0x110] sm:$0xff]  ;;  %v1217_v53 = vld [vmem:[#allocation8 + $0x48] sm:$0xff] }
  0x48   :  { %823 = vmatmul.mubr.msk.bf16.vlgmr.msra.gmra.mxu1 %vm149_vm0, %v78_v8  ;;  %337 = vmatprep.subr.mxu0 %v1145_v29  ;;  %v1220_v54 = vld [vmem:[#allocation8 + $0xf8] sm:$0xff]  ;;  %v1223_v55 = vld [vmem:[#allocation8 + $0x40] sm:$0xff]  ;;  %v1226_v56 = vld [vmem:[#allocation8 + $0xf0] sm:$0xff] }
  0x49   :  { %395 = vmatpush1.msra.mxu1 %v1131_v24  ;;  %338 = vmatpush1.msra.mxu0 %v1151_v31  ;;  %v1229_v57 = vld [vmem:[#allocation8 + $0x28] sm:$0xff]  ;;  %v1232_v58 = vld [vmem:[#allocation8 + $0xd8] sm:$0xff]  ;;  %v1235_v59 = vld [vmem:[#allocation8 + $0x20] sm:$0xff] }
  0x4a   :  { %396 = vmatprep.subr.mxu1 %v1136_v26  ;;  %339 = vmatprep.subr.mxu0 %v1157_v33  ;;  %v1238_v60 = vld [vmem:[#allocation8 + $0xd0] sm:$0xff]  ;;  %v1241_v61 = vld [vmem:[#allocation8 + $0x8] sm:$0xff]  ;;  %v1244_v62 = vld [vmem:[#allocation8 + $0xb8] sm:$0xff] }
  0x4b   :  { %397 = vmatpush1.msra.mxu1 %v1142_v28  ;;  %340 = vmatpush1.msra.mxu0 %v1163_v35  ;;  %v1247_v63 = vld [vmem:[#allocation8] sm:$0xff]  ;;  %v1250_v0 = vld [vmem:[#allocation8 + $0xb0] sm:$0xff]  ;;  %v1254_v2 = vld [vmem:[#allocation8 + $0x98] sm:$0xff] }
  0x4c   :  { %398 = vmatprep.subr.mxu1 %v1148_v30  ;;  %341 = vmatprep.subr.mxu0 %v1169_v37  ;;  %v1258_v3 = vld [vmem:[#allocation8 + $0x90] sm:$0xff]  ;;  %v1262_v4 = vld [vmem:[#allocation8 + $0x78] sm:$0xff] }
  0x4d   :  { %399 = vmatpush1.msra.mxu1 %v1154_v32  ;;  %342 = vmatpush1.msra.mxu0 %v1175_v39  ;;  %v1266_v5 = vld [vmem:[#allocation8 + $0x70] sm:$0xff]  ;;  %v1270_v6 = vld [vmem:[#allocation8 + $0x58] sm:$0xff] }
  0x4e   :  { %400 = vmatprep.subr.mxu1 %v1160_v34  ;;  %343 = vmatprep.subr.mxu0 %v1181_v41  ;;  %v1274_v8 = vld [vmem:[#allocation8 + $0x50] sm:$0xff]  ;;  %v1278_v11 = vld [vmem:[#allocation8 + $0x38] sm:$0xff] }
  0x4f   :  { %401 = vmatpush1.msra.mxu1 %v1166_v36  ;;  %344 = vmatpush1.msra.mxu0 %v1187_v43  ;;  %v1282_v14 = vld [vmem:[#allocation8 + $0x30] sm:$0xff] }
  0x50   :  { %402 = vmatprep.subr.mxu1 %v1172_v38  ;;  %345 = vmatprep.subr.mxu0 %v1193_v45 }
  0x51   :  { %403 = vmatpush1.msra.mxu1 %v1178_v40  ;;  %346 = vmatpush1.msra.mxu0 %v1199_v47 }
  0x52   :  { %404 = vmatprep.subr.mxu1 %v1184_v42  ;;  %347 = vmatprep.subr.mxu0 %v1205_v49 }
  0x53   :  { %405 = vmatpush1.msra.mxu1 %v1190_v44  ;;  %348 = vmatpush1.msra.mxu0 %v1211_v51 }
  0x54   :  { %406 = vmatprep.subr.mxu1 %v1196_v46  ;;  %349 = vmatprep.subr.mxu0 %v1217_v53 }
  0x55   :  { %407 = vmatpush1.msra.mxu1 %v1202_v48  ;;  %350 = vmatpush1.msra.mxu0 %v1223_v55 }
  0x56   :  { %408 = vmatprep.subr.mxu1 %v1208_v50  ;;  %351 = vmatprep.subr.mxu0 %v1229_v57 }
  0x57   :  { %409 = vmatpush1.msra.mxu1 %v1214_v52  ;;  %352 = vmatpush1.msra.mxu0 %v1235_v59 }
  0x58   :  { %410 = vmatprep.subr.mxu1 %v1220_v54  ;;  %353 = vmatprep.subr.mxu0 %v1241_v61 }
  0x59   :  { %411 = vmatpush1.msra.mxu1 %v1226_v56  ;;  %354 = vmatpush1.msra.mxu0 %v1247_v63 }
  0x5a   :  { %412 = vmatprep.subr.mxu1 %v1232_v58  ;;  %388 = vmatmul.mubr.f32.vlgmr.msra.gmra.mxu0 %v1041_v1 }
  0x5b   :  { %413 = vmatpush1.msra.mxu1 %v1238_v60  ;;  %458 = vmatprep.mubr.f32.mxu1 %v1041_v1 }
  0x5c   :  { %414 = vmatprep.subr.mxu1 %v1244_v62  ;;  %517 = vmatprep.subr.mxu0 %v1094_v7  ;;  %v1286_v7 = vld [vmem:[#allocation8 + $0x18] sm:$0xff] }
  0x5d   :  { %415 = vmatpush1.msra.mxu1 %v1250_v0  ;;  %518 = vmatpush1.msra.mxu0 %v1097_v9  ;;  %v1290_v9 = vld [vmem:[#allocation8 + $0x10] sm:$0xff] }
  0x5e   :  { %416 = vmatprep.subr.mxu1 %v1254_v2  ;;  %519 = vmatprep.subr.mxu0 %v1099_v10  ;;  %v89_v10 = vlaneseq }
  0x5f   :  { %417 = vmatpush1.msra.mxu1 %v1258_v3  ;;  %520 = vmatpush1.msra.mxu0 %v1102_v12 }
  0x60   :  { %418 = vmatprep.subr.mxu1 %v1262_v4  ;;  %521 = vmatprep.subr.mxu0 %v1104_v13  ;;  %v90_v12 = vshrl.u32 %v89_v10, 7  ;;  %v722_v10 = vld [vmem:[#allocation9 + $0x68] sm:$0xff] }
  0x61   :  { %419 = vmatpush1.msra.mxu1 %v1266_v5  ;;  %522 = vmatpush1.msra.mxu0 %v1108_v15 }
  0x62   :  { %420 = vmatprep.subr.mxu1 %v1270_v6  ;;  %523 = vmatprep.subr.mxu0 %v1112_v16  ;;  %v91_v13 = vsub.s32 0, %v90_v12  ;;  %v95_v15 = vsub.s32 1, %v90_v12  ;;  %v87_v16 = vld [vmem:[%s1398_s3] sm:$0xf] }
  0x63   :  { %421 = vmatpush1.msra.mxu1 %v1274_v8  ;;  %524 = vmatpush1.msra.mxu0 %v1114_v18  ;;  %v99_v18 = vsub.s32 2, %v90_v12 }
  0x64   :  { %422 = vmatprep.subr.mxu1 %v1278_v11  ;;  %525 = vmatprep.subr.mxu0 %v1117_v19 }
  0x65   :  { %423 = vmatpush1.msra.mxu1 %v1282_v14  ;;  %526 = vmatpush1.msra.mxu0 %v1122_v21  ;;  %v96_v21 = vrot.slane %v87_v16, %v95_v15  ;;  %v719_v15 = vld [vmem:[#allocation9 + $0x50] sm:$0xff] }
  0x66   :  { %424 = vmatprep.subr.mxu1 %v1286_v7  ;;  %527 = vmatprep.subr.mxu0 %v1125_v22  ;;  %v1042_v22 = vmov 1983009808  }
  0x67   :  { %425 = vmatpush1.msra.mxu1 %v1290_v9  ;;  %528 = vmatpush1.msra.mxu0 %v1128_v23  ;;  %v242_v23 = vunpack.c.l.s4 %v1042_v22  ;;  %v712_v22 = vld [vmem:[#allocation9 + $0x18] sm:$0xff] }
  0x68   :  { %459 = vmatmul.mubr.f32.vlgmr.msra.gmra.mxu1 %v1041_v1  ;;  %588 = vmatprep.subr.mxu1 %v1119_v20  ;;  %v92_v20 = vrot.slane %v87_v16, %v91_v13  ;;  %v720_v13 = vld [vmem:[#allocation9 + $0x58] sm:$0xff] }
  0x69   :  { %589 = vmatpush1.msra.mxu1 %v1131_v24  ;;  %529 = vmatprep.subr.mxu0 %v1134_v25  ;;  %v103_v24 = vsub.s32 3, %v90_v12 }
  0x6a   :  { %590 = vmatprep.subr.mxu1 %v1136_v26  ;;  %530 = vmatpush1.msra.mxu0 %v1139_v27  ;;  %v100_v26 = vrot.slane %v87_v16, %v99_v18  ;;  %v716_v18 = vld [vmem:[#allocation9 + $0x38] sm:$0xff] }
  0x6b   :  { %591 = vmatpush1.msra.mxu1 %v1142_v28  ;;  %531 = vmatprep.subr.mxu0 %v1145_v29 }
  0x6c   :  { %592 = vmatprep.subr.mxu1 %v1148_v30  ;;  %532 = vmatpush1.msra.mxu0 %v1151_v31  ;;  %v243_v30 = vunpack.c.0.s8 %v242_v23  ;;  %v104_v31 = vrot.slane %v87_v16, %v103_v24  ;;  %v718_v16 = vld [vmem:[#allocation9 + $0x48] sm:$0xff]  ;;  %v711_v23 = vld [vmem:[#allocation9 + $0x10] sm:$0xff] }
  0x6d   :  { %593 = vmatpush1.msra.mxu1 %v1154_v32  ;;  %533 = vmatprep.subr.mxu0 %v1157_v33  ;;  %v710_v24 = vld [vmem:[#allocation9 + $0x8] sm:$0xff] }
  0x6e   :  { %594 = vmatprep.subr.mxu1 %v1160_v34  ;;  %534 = vmatpush1.msra.mxu0 %v1163_v35 }
  0x6f   :  { %595 = vmatpush1.msra.mxu1 %v1166_v36  ;;  %535 = vmatprep.subr.mxu0 %v1169_v37  ;;  %v246_v36 = vsub.s32 %v243_v30, %v90_v12 }
  0x70   :  { %596 = vmatprep.subr.mxu1 %v1172_v38  ;;  %536 = vmatpush1.msra.mxu0 %v1175_v39 }
  0x71   :  { %597 = vmatpush1.msra.mxu1 %v1178_v40  ;;  %537 = vmatprep.subr.mxu0 %v1181_v41 }
  0x72   :  { %598 = vmatprep.subr.mxu1 %v1184_v42  ;;  %538 = vmatpush1.msra.mxu0 %v1187_v43 }
  0x73   :  { %599 = vmatpush1.msra.mxu1 %v1190_v44  ;;  %539 = vmatprep.subr.mxu0 %v1193_v45  ;;  %v1043_v44 = vmov 1966171168  }
  0x74   :  { %600 = vmatprep.subr.mxu1 %v1196_v46  ;;  %540 = vmatpush1.msra.mxu0 %v1199_v47  ;;  %v472_v45 = vunpack.c.l.s4 %v1043_v44 }
  0x75   :  { %601 = vmatpush1.msra.mxu1 %v1202_v48  ;;  %541 = vmatprep.subr.mxu0 %v1205_v49 }
  0x76   :  { %602 = vmatprep.subr.mxu1 %v1208_v50  ;;  %542 = vmatpush1.msra.mxu0 %v1211_v51  ;;  %v473_v47 = vunpack.c.0.s8 %v472_v45 }
  0x77   :  { %603 = vmatpush1.msra.mxu1 %v1214_v52  ;;  %543 = vmatprep.subr.mxu0 %v1217_v53 }
  0x78   :  { %604 = vmatprep.subr.mxu1 %v1220_v54  ;;  %544 = vmatpush1.msra.mxu0 %v1223_v55  ;;  %v1361_v51 = vsub.s32 %v473_v47, %v90_v12  ;;  %v721_v12 = vld [vmem:[#allocation9 + $0x60] sm:$0xff] }
  0x79   :  { %605 = vmatpush1.msra.mxu1 %v1226_v56  ;;  %545 = vmatprep.subr.mxu0 %v1229_v57 }
  0x7a   :  { %606 = vmatprep.subr.mxu1 %v1232_v58  ;;  %546 = vmatpush1.msra.mxu0 %v1235_v59 }
  0x7b   :  { %607 = vmatpush1.msra.mxu1 %v1238_v60  ;;  %547 = vmatprep.subr.mxu0 %v1241_v61 }
  0x7c   :  { %608 = vmatprep.subr.mxu1 %v1244_v62  ;;  %548 = vmatpush1.msra.mxu0 %v1247_v63 }
  0x7d   :  { %609 = vmatpush1.msra.mxu1 %v1250_v0  ;;  %581 = vmatprep.mubr.f32.mxu0 %v1041_v1 }
  0x7e   :  { %610 = vmatprep.subr.mxu1 %v1254_v2  ;;  %652 = vmatprep.mubr.f32.mxu1 %v1041_v1 }
  0x7f   :  { %611 = vmatpush1.msra.mxu1 %v1258_v3  ;;  %843 = vmatprep.subr.mxu0 %v1041_v1 }
  0x80   :  { %612 = vmatprep.subr.mxu1 %v1262_v4 }
  0x81   :  { %613 = vmatpush1.msra.mxu1 %v1266_v5 }
  0x82   :  { %614 = vmatprep.subr.mxu1 %v1270_v6 }
  0x83   :  { %615 = vmatpush1.msra.mxu1 %v1274_v8 }
  0x84   :  { %616 = vmatprep.subr.mxu1 %v1278_v11 }
  0x85   :  { %617 = vmatpush1.msra.mxu1 %v1282_v14 }
  0x86   :  { %618 = vmatprep.subr.mxu1 %v1286_v7  ;;  %v724_v7 = vld [vmem:[#allocation9 + $0x78] sm:$0xff] }
  0x87   :  { %619 = vmatpush1.msra.mxu1 %v1290_v9  ;;  %v723_v9 = vld [vmem:[#allocation9 + $0x70] sm:$0xff] }
 0x100   :  { %v187_v17 = vpop.f32.mrf.mxu1 }
 0x101   :  { %v188_v28 = vadd.f32 %v187_v17, %v92_v20  ;;  %v717_v17 = vld [vmem:[#allocation9 + $0x40] sm:$0xff]  ;;  %v714_v20 = vld [vmem:[#allocation9 + $0x28] sm:$0xff] }
 0x102   :  { %v189_v19 = vpop.f32.mrf.mxu1 }
 0x103   :  { %v190_v29 = vadd.f32 %v189_v19, %v96_v21  ;;  %v715_v19 = vld [vmem:[#allocation9 + $0x30] sm:$0xff]  ;;  %v713_v21 = vld [vmem:[#allocation9 + $0x20] sm:$0xff] }
 0x104   :  { %v191_v25 = vpop.f32.mrf.mxu1 }
 0x105   :  { %v239_v35 = vcombine.low %v188_v28, %v190_v29  ;;  %v709_v25 = vld [vmem:[#allocation9] sm:$0xff] }
 0x106   :  { %v192_v27 = vpop.f32.mrf.mxu1 }
 0x107   :  { %v247_v41 = vrot.slane %v239_v35, %v246_v36 }
 0x108   :  { %v228_v32 = vpop.f32.mrf.mxu1 }
 0x109   :  { %v229_v33 = vadd.f32 %v228_v32, %v100_v26 }
 0x10a   :  { %v230_v34 = vpop.f32.mrf.mxu1 }
 0x10b   :  { %v231_v37 = vadd.f32 %v230_v34, %v104_v31 }
 0x10c   :  { %v232_v38 = vpop.f32.mrf.mxu1 }
 0x10d   :  { %v240_v39 = vcombine.low %v229_v33, %v231_v37 }
 0x10e   :  { %v233_v40 = vpop.f32.mrf.mxu1 }
 0x10f   :  { %v254_v42 = vrot.slane %v240_v39, %v246_v36 }
 0x111   :  { %v255_v43 = vcombine.low %v247_v41, %v254_v42 }
 0x113   :  { %257 = vst [vmem:[#allocation2] sm:$0xff] %v255_v43 }
 0x11a   :  { %v389_v46 = vpop.f32.mrf.mxu0  ;;  %v258_v58 = vld [vmem:[#allocation2] ss:$2 sm:$0xf]  ;;  %v516_v36 = vld [vmem:[#allocation2 + $0x1] ss:$2 sm:$0xf] }
 0x11c   :  { %v391_v48 = vpop.f32.mrf.mxu0 }
 0x11d   :  { %v469_v50 = vcombine.low %v389_v46, %v391_v48 }
 0x11f   :  { %v477_v54 = vrot.slane %v469_v50, %v1361_v51  ;;  %v725_v50 = vld [vmem:[%s1400_s5] sm:$0x1] }
 0x128   :  { %v460_v49 = vpop.f32.mrf.mxu1 }
 0x12a   :  { %v462_v52 = vpop.f32.mrf.mxu1 }
 0x12b   :  { %v470_v53 = vcombine.low %v460_v49, %v462_v52 }
 0x12d   :  { %v484_v55 = vrot.slane %v470_v53, %v1361_v51 }
 0x12f   :  { %v485_v56 = vcombine.low %v477_v54, %v484_v55 }
 0x131   :  { %v492_v57 = vrot.slane %v485_v56, %v1361_v51 }
 0x133   :  { %v494_v59 = vadd.f32 %v492_v57, %v258_v58 }
 0x135   :  { %v824_v60 = vmul.f32 -1.442695, %v494_v59  ;;  %v502_v63 = vrot.slane %v494_v59, 3 }
 0x137   :  { %906 = vpow2.f32 %v824_v60 }
 0x144   :  { %v907_v61 = vpop.eup %906 }
 0x145   :  { %v498_v62 = vadd.f32 1.0, %v907_v61 }
 0x147   :  { %908 = vrcp.f32 %v498_v62 }
 0x148   :  { %910 = vtanh.f32 %v502_v63 }
 0x154   :  { %v909_v0 = vpop.eup %908 }
 0x155   :  { %v506_v2 = vrot.slane %v909_v0, 1  ;;  %v911_v3 = vpop.eup %910  ;;  %v512_v8 = vrot.slane %v909_v0, 2 }
 0x156   :  { %v509_v4 = vmul.f32 %v911_v3, %v909_v0 }
 0x157   :  { %v508_v5 = vmul.f32 0.0, %v506_v2 }
 0x159   :  { %v1366_v6 = vadd.f32 %v509_v4, %v508_v5 }
 0x15b   :  { %912 = vtanh.f32 %v1366_v6 }
 0x168   :  { %v913_v11 = vpop.eup %912 }
 0x169   :  { %v514_v14 = vmul.f32 %v913_v11, %v512_v8 }
 0x16b   :  { %582 = vmatmul.mubr.f32.vlgmr.msra.gmra.mxu0 %v514_v14  ;;  %653 = vmatmul.mubr.f32.vlgmr.msra.gmra.mxu1 %v514_v14 }
 0x16c   :  { %844 = vmatpush3.msra.mxu0 %v724_v7  ;;  %875 = vmatprep.mubr.msk.f32.mxu0 %vm1044_vm1, %v1041_v1 }
 0x16d   :  { %845 = vmatprep.subr.mxu0 %v1041_v1 }
 0x16e   :  { %846 = vmatpush3.msra.mxu0 %v723_v9 }
 0x16f   :  { %847 = vmatprep.subr.mxu0 %v1041_v1 }
 0x170   :  { %848 = vmatpush3.msra.mxu0 %v722_v10 }
 0x171   :  { %849 = vmatprep.subr.mxu0 %v1041_v1 }
 0x172   :  { %850 = vmatpush3.msra.mxu0 %v721_v12 }
 0x173   :  { %851 = vmatprep.subr.mxu0 %v1041_v1 }
 0x174   :  { %852 = vmatpush3.msra.mxu0 %v720_v13 }
 0x175   :  { %853 = vmatprep.subr.mxu0 %v1041_v1 }
 0x176   :  { %854 = vmatpush3.msra.mxu0 %v719_v15 }
 0x177   :  { %855 = vmatprep.subr.mxu0 %v1041_v1 }
 0x178   :  { %856 = vmatpush3.msra.mxu0 %v718_v16 }
 0x179   :  { %857 = vmatprep.subr.mxu0 %v1041_v1 }
 0x17a   :  { %858 = vmatpush3.msra.mxu0 %v717_v17 }
 0x17b   :  { %859 = vmatprep.subr.mxu0 %v1041_v1 }
 0x17c   :  { %860 = vmatpush3.msra.mxu0 %v716_v18 }
 0x17d   :  { %861 = vmatprep.subr.mxu0 %v1041_v1 }
 0x17e   :  { %862 = vmatpush3.msra.mxu0 %v715_v19 }
 0x17f   :  { %863 = vmatprep.subr.mxu0 %v1041_v1 }
 0x180   :  { %864 = vmatpush3.msra.mxu0 %v714_v20 }
 0x181   :  { %865 = vmatprep.subr.mxu0 %v1041_v1 }
 0x182   :  { %866 = vmatpush3.msra.mxu0 %v713_v21 }
 0x183   :  { %867 = vmatprep.subr.mxu0 %v1041_v1 }
 0x184   :  { %868 = vmatpush3.msra.mxu0 %v712_v22 }
 0x185   :  { %869 = vmatprep.subr.mxu0 %v1041_v1 }
 0x186   :  { %870 = vmatpush3.msra.mxu0 %v711_v23 }
 0x187   :  { %871 = vmatprep.subr.mxu0 %v1041_v1 }
 0x188   :  { %872 = vmatpush3.msra.mxu0 %v710_v24 }
 0x189   :  { %873 = vmatprep.subr.mxu0 %v1041_v1 }
 0x18a   :  { %874 = vmatpush3.msra.mxu0 %v709_v25 }
 0x22b   :  { %v583_v26 = vpop.f32.mrf.mxu0  ;;  %v654_v27 = vpop.f32.mrf.mxu1 }
 0x22d   :  { %v585_v28 = vpop.f32.mrf.mxu0  ;;  %v656_v29 = vpop.f32.mrf.mxu1 }
 0x22e   :  { %v663_v30 = vcombine.low %v583_v26, %v585_v28  ;;  %v664_v31 = vcombine.low %v654_v27, %v656_v29 }
 0x230   :  { %v671_v32 = vrot.slane %v663_v30, %v1361_v51  ;;  %v678_v33 = vrot.slane %v664_v31, %v1361_v51 }
 0x232   :  { %v679_v34 = vcombine.low %v671_v32, %v678_v33 }
 0x234   :  { %v686_v35 = vrot.slane %v679_v34, %v1361_v51 }
 0x236   :  { %v688_v37 = vadd.f32 %v686_v35, %v516_v36 }
 0x238   :  { %v825_v38 = vmul.f32 -1.442695, %v688_v37  ;;  %v696_v40 = vrot.slane %v688_v37, 3 }
 0x23a   :  { %914 = vpow2.f32 %v825_v38 }
 0x247   :  { %v915_v39 = vpop.eup %914 }
 0x248   :  { %v692_v1 = vadd.f32 1.0, %v915_v39 }
 0x24a   :  { %916 = vrcp.f32 %v692_v1 }
 0x24b   :  { %918 = vtanh.f32 %v696_v40 }
 0x257   :  { %v917_v41 = vpop.eup %916 }
 0x258   :  { %v700_v42 = vrot.slane %v917_v41, 1  ;;  %v919_v43 = vpop.eup %918  ;;  %v706_v47 = vrot.slane %v917_v41, 2 }
 0x259   :  { %v703_v45 = vmul.f32 %v919_v43, %v917_v41 }
 0x25a   :  { %v702_v44 = vmul.f32 %v700_v42, %v1366_v6 }
 0x25c   :  { %v704_v46 = vadd.f32 %v703_v45, %v702_v44 }
 0x25e   :  { %920 = vtanh.f32 %v704_v46 }
 0x26b   :  { %v921_v48 = vpop.eup %920 }
 0x26c   :  { %v708_v49 = vmul.f32 %v921_v48, %v706_v47 }
 0x26e   :  { %876 = vmatmul.mubr.f32.vlgmr.msra.gmra.mxu0 %v708_v49 }
 0x32e   :  { %v792_v51 = vpop.f32.mrf.mxu0 }
 0x32f   :  { %v793_v52 = vadd.f32 %v792_v51, %v725_v50 }
 0x330   :  { %v877_v53 = vpop.f32.mrf.mxu0 }
 0x331   :  { %796 = vst [vmem:[#allocation11] sm:$0x1] %v793_v52 }
 0x332   :  { %1013 = shalt.err (!%p1010_p10)
}
 0x333   :  { %806 = dma.vmem_to_hbm [thread:$0]  %s804_s24, 16, %s1401_s6, [#allocation5]  }
 0x334   :  { %1028 = dma.done.wait [#allocation5], 16  }
 0x335   :  { %1029 = vsyncadd [#allocation5], 4294967280 }
 0x336   :  { %810 = vsyncpa [#allocation4], 1 }
 0x337   :  { %811 = vsyncpa [#allocation7], 1 }
 0x338   :  { %812 = vsyncpa [#allocation10], 1 }
 0x339   :  { %813 = vsyncpa [#allocation5], 1 }

</bundles_post_ra>
